<compile_context>
chip_gen: v7x
topology: tpu7x:2x2x1
jax: 0.10.0
libtpu: 0.0.40
codegen_flags: <defaults>
</compile_context>

<pallas_src>
import jax
import jax.numpy as jnp
from jax.experimental import pallas as pl
from jax.experimental.pallas import tpu as pltpu


def logistic_kernel(wb_ref, x_ref, o_ref):
    # wb_ref: SMEM (3,) f32 = [w0, w1, b]
    # x_ref : VMEM (2, TILE_R, 128) f32, batch on (sublane, lane)
    # o_ref : VMEM (TILE_R, 128) f32, fully dense output tile
    w0 = wb_ref[0]
    w1 = wb_ref[1]
    b = wb_ref[2]

    x0 = x_ref[0]                        # (TILE_R, 128)
    x1 = x_ref[1]                        # (TILE_R, 128)
    y = x0 * w0 + x1 * w1 + b            # pure VPU FMA, no MXU

    # sigmoid(y) = 0.5 * tanh(0.5 * y) + 0.5  -> one EUP push, no approx recip.
    o_ref[...] = (0.5 * jnp.tanh(0.5 * y) + 0.5).astype(o_ref.dtype)


def logistic_forward(x, w, b, *, tile_rows=4096):
    """x: [N, 2] f32, w: [2, 1] f32 (stored as W.T), b: [1] f32 -> [N, 1] f32.

    Batch is laid out dense over (sublane, lane): N is padded to a multiple of
    128*tile_r and viewed as [rows, 128]. Default tile_rows=4096 gives 512K
    elements (~6 MB) per grid step; raise it further for very large N if VMEM
    allows (per-step footprint = 12 B/elem, double-buffered).
    """
    n = x.shape[0]
    rows = int(pl.cdiv(n, 128))                       # rows of 128 lanes
    tile_r = min(int(tile_rows), max(8, int(pl.cdiv(rows, 8)) * 8))
    tile_r = max(8, (tile_r // 8) * 8)                # multiple of 8 sublanes
    num_tiles = int(pl.cdiv(rows, tile_r))
    rows_pad = num_tiles * tile_r
    n_pad = rows_pad * 128

    # One fused transpose+pad (XLA fuses these), then a free reshape to
    # the sublane-dense [2, rows_pad, 128] layout.
    xt = jnp.pad(x.astype(jnp.float32).T, ((0, 0), (0, n_pad - n)))
    xt = xt.reshape(2, rows_pad, 128)
    wb = jnp.concatenate([w.reshape(-1), b.reshape(-1)]).astype(jnp.float32)  # (3,)

    # Per-step VMEM: (2 in + 1 out) * tile_r * 128 * 4 B, double-buffered.
    per_step_bytes = 3 * tile_r * 128 * 4
    vmem_limit = min(2 * per_step_bytes + (4 << 20), 48 << 20)

    out = pl.pallas_call(
        logistic_kernel,
        out_shape=jax.ShapeDtypeStruct((rows_pad, 128), jnp.float32),
        grid=(num_tiles,),
        in_specs=[
            pl.BlockSpec(memory_space=pltpu.MemorySpace.SMEM),        # [w0, w1, b]
            pl.BlockSpec((2, tile_r, 128), lambda i: (0, i, 0)),      # x tile (dense)
        ],
        out_specs=pl.BlockSpec((tile_r, 128), lambda i: (i, 0)),      # dense output tile
        compiler_params=pltpu.CompilerParams(
            dimension_semantics=("parallel",),                        # megacore on v7x
            vmem_limit_bytes=vmem_limit,
        ),
    )(wb, xt)

    out_flat = out.reshape(n_pad)
    if n_pad == n:
        return out_flat.reshape(n, 1)                 # pure reshape, no copy
    return out_flat[:n].reshape(n, 1)                 # drop padded tail rows


if __name__ == "__main__":
    key = jax.random.PRNGKey(0)
    kx, kw, kb = jax.random.split(key, 3)

    # Deterministic params mimicking nn.Linear(2,1)'s U(-1/sqrt(2), 1/sqrt(2)).
    bound = 1.0 / jnp.sqrt(2.0)
    w = jax.random.uniform(kw, (2, 1), minval=-bound, maxval=bound,
                           dtype=jnp.float32)   # stored as [in, out] = W.T
    b = jax.random.uniform(kb, (1,), minval=-bound, maxval=bound,
                           dtype=jnp.float32)

    # Small case consistent with the module: batch=8, in_features=2.
    x = jax.random.normal(kx, (8, 2), dtype=jnp.float32)
    out = jax.block_until_ready(logistic_forward(x, w, b))
    ref = jax.nn.sigmoid(x @ w + b)
    assert out.shape == (8, 1)
    assert jnp.allclose(out, ref, atol=2e-3, rtol=2e-3), (out, ref)

    # Ragged batch (not a multiple of 128) exercising the padded path.
    x2 = jax.random.normal(kx, (1000, 2), dtype=jnp.float32)
    out2 = jax.block_until_ready(logistic_forward(x2, w, b))
    ref2 = jax.nn.sigmoid(x2 @ w + b)
    assert out2.shape == (1000, 1)
    assert jnp.allclose(out2, ref2, atol=2e-3, rtol=2e-3)

    # Multi-tile grid path (small tile_rows to force >1 grid step + padding).
    x3 = jax.random.normal(kx, (2500, 2), dtype=jnp.float32)
    out3 = jax.block_until_ready(logistic_forward(x3, w, b, tile_rows=8))
    ref3 = jax.nn.sigmoid(x3 @ w + b)
    assert out3.shape == (2500, 1)
    assert jnp.allclose(out3, ref3, atol=2e-3, rtol=2e-3)

    print("KERNEL_OK")
</pallas_src>

<mosaic_0001>
module attributes {stable_mosaic.version = 11 : i64} {
  func.func @logistic_kernel(%arg0: i32, %arg1: memref<3xf32, #tpu.memory_space<smem>>, %arg2: memref<2x8x128xf32, #tpu.memory_space<vmem>>, %arg3: memref<8x128xf32, #tpu.memory_space<vmem>>) attributes {dimension_semantics = [#tpu.dimension_semantics<parallel>], iteration_bounds = array<i64: 1>, scalar_prefetch = 0 : i64, scratch_operands = 0 : i64, tpu.core_type = #tpu.core_type<tc>, window_params = [{transform_indices = @transform_0, window_bounds = array<i64: 3>}, {transform_indices = @transform_1, window_bounds = array<i64: 2, 8, 128>}, {transform_indices = @transform_2, window_bounds = array<i64: 8, 128>}]} {
    %c0 = arith.constant 0 : index
    %0 = memref.load %arg1[%c0] : memref<3xf32, #tpu.memory_space<smem>>
    %c1 = arith.constant 1 : index
    %1 = memref.load %arg1[%c1] : memref<3xf32, #tpu.memory_space<smem>>
    %c2 = arith.constant 2 : index
    %2 = memref.load %arg1[%c2] : memref<3xf32, #tpu.memory_space<smem>>
    %c0_0 = arith.constant 0 : index
    %c0_1 = arith.constant 0 : index
    %c0_2 = arith.constant 0 : index
    %3 = vector.load %arg2[%c0_0, %c0_1, %c0_2] : memref<2x8x128xf32, #tpu.memory_space<vmem>>, vector<1x8x128xf32>
    %4 = vector.shape_cast %3 : vector<1x8x128xf32> to vector<8x128xf32>
    %c1_3 = arith.constant 1 : index
    %c0_4 = arith.constant 0 : index
    %c0_5 = arith.constant 0 : index
    %5 = vector.load %arg2[%c1_3, %c0_4, %c0_5] : memref<2x8x128xf32, #tpu.memory_space<vmem>>, vector<1x8x128xf32>
    %6 = vector.shape_cast %5 : vector<1x8x128xf32> to vector<8x128xf32>
    %7 = vector.broadcast %0 : f32 to vector<8x128xf32>
    %8 = arith.mulf %4, %7 : vector<8x128xf32>
    %9 = vector.broadcast %1 : f32 to vector<8x128xf32>
    %10 = arith.mulf %6, %9 : vector<8x128xf32>
    %11 = arith.addf %8, %10 : vector<8x128xf32>
    %12 = vector.broadcast %2 : f32 to vector<8x128xf32>
    %13 = arith.addf %11, %12 : vector<8x128xf32>
    %cst = arith.constant 5.000000e-01 : f32
    %14 = vector.broadcast %cst : f32 to vector<8x128xf32>
    %15 = arith.mulf %14, %13 : vector<8x128xf32>
    %16 = math.tanh %15 : vector<8x128xf32>
    %cst_6 = arith.constant 5.000000e-01 : f32
    %17 = vector.broadcast %cst_6 : f32 to vector<8x128xf32>
    %18 = arith.mulf %17, %16 : vector<8x128xf32>
    %cst_7 = arith.constant 5.000000e-01 : f32
    %19 = vector.broadcast %cst_7 : f32 to vector<8x128xf32>
    %20 = arith.addf %18, %19 : vector<8x128xf32>
    %c0_8 = arith.constant 0 : index
    %c0_9 = arith.constant 0 : index
    %21 = vector.load %arg3[%c0_8, %c0_9] : memref<8x128xf32, #tpu.memory_space<vmem>>, vector<8x128xf32>
    tpu.vector_store %arg3[%c0_8, %c0_9], %20 {strides = array<i32>} : memref<8x128xf32, #tpu.memory_space<vmem>>, vector<8x128xf32>,
    return
  }
  func.func @transform_0(%arg0: i32) -> i32 {
    %c0_i32 = arith.constant 0 : i32
    %c0_i32_0 = arith.constant 0 : i32
    return %c0_i32 : i32
  }
  func.func @transform_1(%arg0: i32) -> (i32, i32, i32) {
    %c0_i32 = arith.constant 0 : i32
    %c0_i32_0 = arith.constant 0 : i32
    %c0_i32_1 = arith.constant 0 : i32
    return %c0_i32, %arg0, %c0_i32_0 : i32, i32, i32
  }
  func.func @transform_2(%arg0: i32) -> (i32, i32) {
    %c0_i32 = arith.constant 0 : i32
    %c0_i32_0 = arith.constant 0 : i32
    return %arg0, %c0_i32 : i32, i32
  }
}

</mosaic_0001>

<bundles_post_ra>
// kernel: tpu_custom_call.1
= control target key start
LH: loop header
LB: loop body
LE: loop exit
PB: predicated region body
PF: predicated region fallthrough
CT: control target
= control target key end

     0   :  { %7 = vsyncpa [#allocation5], 0  ;;  %s196_s0 = inlined_call_operand.hbm [shape: f32[3], index: 0, kind: input, shape index: {}]   ;;  %s197_s1 = inlined_call_operand.hbm [shape: f32[2,8,128], index: 1, kind: input, shape index: {}]   ;;  %s198_s2 = inlined_call_operand.hbm [shape: f32[8,128], index: 2, kind: output, shape index: {}]  }
   0x1   :  { %8 = vsyncpa [#allocation3], 0 }
   0x2   :  { %9 = vsyncpa [#allocation4], 0  ;;  %s80_s11 = scalar_lea.hbm %s196_s0, 16 }
   0x3   :  { %p81_p0 = scmp.ne.s32.totalorder %s196_s0, %s80_s11  ;;  %p84_p1 = scmp.lt.u32.totalorder %s80_s11, %s196_s0 }
   0x5   :  { %p86_p2 = pnand %p84_p1, %p81_p0 }
   0x7   :  { %89 = shalt.err (!%p86_p2)
}
   0x8   :  { %s140_s16 = smov [#allocation2]   ;;  %s141_s19 = smov [#allocation6]  }
   0x9   :  { %17 = dma.hbm_to_smem %s196_s0, 16, %s140_s16, [#allocation5]  }
   0xa   :  { %s23_s20 = sshll.u32 %s141_s19, 4  ;;  %s90_s23 = scalar_lea.hbm %s197_s1, 256  ;;  %s24_s20 = int_to_ptr.vmem [resolvable:$true] %s23_s20 }
   0xb   :  { %p91_p3 = scmp.ne.s32.totalorder %s197_s1, %s90_s23  ;;  %p94_p4 = scmp.lt.u32.totalorder %s90_s23, %s197_s1 }
   0xd   :  { %p96_p5 = pnand %p94_p4, %p91_p3 }
   0xf   :  { %99 = shalt.err (!%p96_p5)
}
  0x10   :  { %s100_s28 = scalar_lea.vmem %s24_s20, 256  ;;  %p105_p7 = scmp.lt.s32.totalorder %s24_s20, %s24_s20 }
  0x11   :  { %p101_p6 = scmp.ne.s32.totalorder %s24_s20, %s100_s28  ;;  %p106_p8 = scmp.lt.s32.totalorder %s100_s28, %s100_s28 }
  0x13   :  { %p107_p9 = por %p106_p8, %p105_p7 }
  0x15   :  { %p108_p10 = pnand %p107_p9, %p101_p6 }
  0x17   :  { %111 = shalt.err (!%p108_p10)
}
  0x18   :  { %s142_s0 = smov 128   ;;  %s143_s29 = smov 8  }
  0x19   :  { %29 = dma.hbm_to_vmem [thread:$0]  %s197_s1, 256, %s24_s20, [#allocation3], %s142_s0, %s142_s0, %s143_s29  }
  0x1a   :  { %134 = dma.done.wait [#allocation5], 16  }
  0x1b   :  { %135 = vsyncadd [#allocation5], 4294967280 }
  0x1c   :  { %136 = dma.done.wait [#allocation3], 256  }
  0x1d   :  { %137 = vsyncadd [#allocation3], 4294967040 }
  0x1e   :  { %36 = sfence }
  0x1f   :  { %s37_s4 = sld [smem:[#allocation2]]  ;;  %s71_s5 = sld [smem:[#allocation2 + $0x1]]  ;;  %v40_v0 = vld [vmem:[#allocation6] sm:$0xff]  ;;  %v42_v1 = vld [vmem:[#allocation6 + $0x8] sm:$0xff] }
  0x20   :  { %s72_s6 = sld [smem:[#allocation2 + $0x2]]  ;;  %s144_s1 = smov [#allocation7]  }
  0x21   :  { %s61_s7 = sshll.u32 %s144_s1, 4  ;;  %s62_s7 = int_to_ptr.vmem [resolvable:$true] %s61_s7 }
  0x22   :  { %s112_s8 = scalar_lea.vmem %s62_s7, 128  ;;  %p117_p12 = scmp.lt.s32.totalorder %s62_s7, %s62_s7 }
  0x23   :  { %p113_p11 = scmp.ne.s32.totalorder %s62_s7, %s112_s8  ;;  %p118_p13 = scmp.lt.s32.totalorder %s112_s8, %s112_s8 }
  0x25   :  { %v43_v2 = vstv %s37_s4  ;;  %v45_v3 = vstv %s71_s5  ;;  %p119_p0 = por %p118_p13, %p117_p12 }
  0x26   :  { %v44_v4 = vmul.f32 %v43_v2, %v40_v0  ;;  %v46_v5 = vmul.f32 %v45_v3, %v42_v1  ;;  %v48_v6 = vstv %s72_s6 }
  0x27   :  { %p120_p1 = pnand %p119_p0, %p113_p11 }
  0x28   :  { %v47_v7 = vadd.f32 %v46_v5, %v44_v4 }
  0x2a   :  { %v49_v8 = vadd.f32 %v48_v6, %v47_v7 }
  0x2c   :  { %v50_v9 = vmul.f32 0.5, %v49_v8 }
  0x2e   :  { %78 = vtanh.f32 %v50_v9 }
  0x38   :  { %v79_v10 = vpop.eup %78 }
  0x39   :  { %v52_v11 = vmul.f32 0.5, %v79_v10 }
  0x3b   :  { %v53_v12 = vadd.f32 0.5, %v52_v11 }
  0x3d   :  { %54 = vst [vmem:[#allocation7] sm:$0xff] %v53_v12 }
  0x3e   :  { %123 = shalt.err (!%p120_p1)
}
  0x3f   :  { %s124_s11 = scalar_lea.hbm %s198_s2, 128 }
  0x40   :  { %p125_p2 = scmp.ne.s32.totalorder %s198_s2, %s124_s11  ;;  %p128_p3 = scmp.lt.u32.totalorder %s124_s11, %s198_s2 }
  0x42   :  { %p130_p4 = pnand %p128_p3, %p125_p2 }
  0x44   :  { %133 = shalt.err (!%p130_p4)
}
  0x45   :  { %64 = dma.vmem_to_hbm [thread:$0]  %s62_s7, 128, %s198_s2, [#allocation4]  }
  0x46   :  { %138 = dma.done.wait [#allocation4], 128  }
  0x47   :  { %139 = vsyncadd [#allocation4], 4294967168 }
  0x48   :  { %68 = vsyncpa [#allocation3], 1 }
  0x49   :  { %69 = vsyncpa [#allocation4], 1 }
  0x4a   :  { %70 = vsyncpa [#allocation5], 1 }

</bundles_post_ra>
